<compile_context>
chip_gen: v6e
topology: v6e:2x2x1
jax: 0.10.0
libtpu: 0.0.40
codegen_flags: <defaults>
</compile_context>

<pallas_src>
import jax
import jax.numpy as jnp
from jax.experimental import pallas as pl
from jax.experimental.pallas import tpu as pltpu

_NUM_STATS = 8
_MIN_GRID_STEPS = 4          # give v7x's two TensorCores something to split


def _round_up(x, m):
    return (x + m - 1) // m * m


def _sublane_multiple(dtype):
    # second-to-last block dim alignment: 8 for 4-byte, 16 for 2-byte, 32 for 1-byte
    return {4: 8, 2: 16, 1: 32}.get(jnp.dtype(dtype).itemsize, 8)


def _vmem_budget():
    """Per-input block byte cap and scoped-VMEM limit, per TPU generation."""
    cap = 64 * 1024 * 1024                       # conservative default (v7x per-TC)
    try:
        info = pltpu.get_tpu_info()
        c = int(getattr(info, "vmem_capacity_bytes", 0))
        if c > 0:
            cap = c
    except Exception:
        pass
    # 2 inputs x 2 pipeline buffers + a handful of live f32 block temporaries
    # inside the kernel -> keep each input block at <= cap/16 (8 MiB on
    # v5e/v6e's 128 MiB, 4 MiB on v7x's 64 MiB).
    block_cap = min(8 * 1024 * 1024, cap // 16)
    vmem_limit = min(96 * 1024 * 1024, (cap * 3) // 4)
    return block_cap, vmem_limit


def _pick_bc_block(bc, hw, dtypes, block_cap_bytes):
    """Images per block: as large as the VMEM budget allows, sublane-aligned,
    but small enough that the parallel grid axis has several steps."""
    sub = max(_sublane_multiple(d) for d in dtypes)
    bytes_per_img = _round_up(hw, 128) * 4        # f32 working set dominates
    blk = max(1, block_cap_bytes // bytes_per_img)
    if bc >= _MIN_GRID_STEPS:
        blk = min(blk, pl.cdiv(bc, _MIN_GRID_STEPS))
    if blk >= bc:
        return bc                                 # full axis: always legal
    blk = max(sub, (blk // sub) * sub)            # keep (8/16,128) tiling legal
    return min(blk, bc)


# ----------------------------------------------------------------------------
# Pallas kernel: one pass over pred/target -> per-(b,c) partial sums
#   col 0: sum |p - t|                       (L1 numerator)
#   col 1: sum |grad_x(p - t)|               over (H-1)*W valid pairs
#   col 2: sum |grad_y(p - t)|               over H*(W-1) valid pairs
#   col 3: sum relu(|p| - 1)                 (range penalty numerator)
#   col 4: sum p          col 5: sum (p - mean_p)^2   (centred, two-pass)
#   col 6: sum t          col 7: sum (t - mean_t)^2
# ----------------------------------------------------------------------------

def _make_stats_kernel(H, W):
    HW = H * W

    def kernel(p_ref, t_ref, o_ref):
        # p_ref/t_ref: (blk, H*W) in the caller's dtype; o_ref: (blk, 8) f32
        p = p_ref[...].astype(jnp.float32)
        t = t_ref[...].astype(jnp.float32)
        d = p - t
        blk = p.shape[0]

        def rsum(x):                               # (blk, n) -> (blk, 1)
            return jnp.sum(x, axis=1, keepdims=True)

        # --- L1 ---------------------------------------------------------
        o_ref[:, 0:1] = rsum(jnp.abs(d))

        # --- gradient along H: flat index i pairs with i + W -------------
        # Lane-offset slice on the lane-dense flat axis: one XLU rotate per
        # vreg for realignment, no seam mask needed (valid range is [0,(H-1)W)).
        if H > 1:
            gx = jnp.abs(d[:, : HW - W] - d[:, W:])
            o_ref[:, 1:2] = rsum(gx)
        else:
            o_ref[:, 1:2] = jnp.zeros((blk, 1), jnp.float32)

        # --- gradient along W: i pairs with i + 1, masking row seams ------
        if W > 1:
            gy = jnp.abs(d[:, : HW - 1] - d[:, 1:])
            col = jax.lax.broadcasted_iota(jnp.int32, gy.shape, 1) % W
            o_ref[:, 2:3] = rsum(jnp.where(col != (W - 1), gy, 0.0))
        else:
            o_ref[:, 2:3] = jnp.zeros((blk, 1), jnp.float32)

        # --- range penalty ------------------------------------------------
        o_ref[:, 3:4] = rsum(jnp.maximum(jnp.abs(p) - 1.0, 0.0))

        # --- per-image sums + centred second moments (two-pass variance) --
        sp = rsum(p)
        st = rsum(t)
        inv_hw = jnp.float32(1.0 / HW)
        pc = p - sp * inv_hw
        tc = t - st * inv_hw
        o_ref[:, 4:5] = sp
        o_ref[:, 5:6] = rsum(pc * pc)
        o_ref[:, 6:7] = st
        o_ref[:, 7:8] = rsum(tc * tc)

    return kernel


def loss_stats(pred, target):
    """(B, C, H, W) x2 -> (B*C, 8) per-image partial sums via one Pallas pass."""
    B, C, H, W = pred.shape
    BC, HW = B * C, H * W

    # Free views (NCHW is contiguous); keep the caller's dtype — bf16 inputs
    # are read as bf16 from HBM and only cast to f32 inside the kernel.
    p = pred.reshape(BC, HW)
    t = target.reshape(BC, HW)

    block_cap, vmem_limit = _vmem_budget()
    # TODO(synk): for images so large that a single (1, H*W) block exceeds the
    # VMEM budget, add an inner "arbitrary" grid axis over H (pl.when
    # init/finalise + 1-row halo for grad_x); not needed at these sizes.
    blk = _pick_bc_block(BC, HW, (pred.dtype, target.dtype), block_cap)
    grid = (pl.cdiv(BC, blk),)      # ragged final block is handled by Pallas

    return pl.pallas_call(
        _make_stats_kernel(H, W),
        out_shape=jax.ShapeDtypeStruct((BC, _NUM_STATS), jnp.float32),
        grid=grid,
        in_specs=[
            pl.BlockSpec((blk, HW), lambda g: (g, 0)),
            pl.BlockSpec((blk, HW), lambda g: (g, 0)),
        ],
        out_specs=pl.BlockSpec((blk, _NUM_STATS), lambda g: (g, 0)),
        compiler_params=pltpu.CompilerParams(
            dimension_semantics=("parallel",),
            vmem_limit_bytes=vmem_limit,
        ),
    )(p, t)


# ----------------------------------------------------------------------------
# Forward pass (matches AMSR2SpecificLoss.forward)
# ----------------------------------------------------------------------------

def amsr2_specific_loss(pred, target, alpha=1.0, beta=0.15, gamma=0.05):
    B, C, H, W = pred.shape
    BC, HW = B * C, H * W

    s = loss_stats(pred, target)                 # (BC, 8)

    # L1 loss (mean over all elements)
    l1_loss = jnp.sum(s[:, 0]) / (BC * HW)

    # gradient loss: L1 over grad_x ((H-1)*W pairs) + L1 over grad_y (H*(W-1))
    # TODO(synk): H==1 / W==1 / HW==1 give zero denominators here and in the
    # std below, matching torch's NaN behaviour on such degenerate inputs.
    grad_loss = (jnp.sum(s[:, 1]) / (BC * (H - 1) * W)
                 + jnp.sum(s[:, 2]) / (BC * H * (W - 1)))

    # brightness-temperature consistency
    range_penalty = jnp.sum(s[:, 3]) / (BC * HW)
    pred_mean = s[:, 4] / HW
    target_mean = s[:, 6] / HW
    energy_loss = jnp.mean((pred_mean - target_mean) ** 2)
    # torch.std default is unbiased (correction=1); s[:,5]/s[:,7] are centred.
    pred_std = jnp.sqrt(s[:, 5] / (HW - 1))
    target_std = jnp.sqrt(s[:, 7] / (HW - 1))
    distribution_loss = jnp.mean((pred_std - target_std) ** 2)
    phys_loss = energy_loss + 0.5 * distribution_loss + 0.1 * range_penalty

    total_loss = alpha * l1_loss + beta * grad_loss + gamma * phys_loss
    return total_loss, {
        'l1_loss': l1_loss,
        'gradient_loss': grad_loss,
        'physical_loss': phys_loss,
        'total_loss': total_loss,
    }


# ----------------------------------------------------------------------------
# Pure-JAX reference (numerical self-check only)
# ----------------------------------------------------------------------------

def _reference_loss(pred, target, alpha=1.0, beta=0.15, gamma=0.05):
    pred = pred.astype(jnp.float32)
    target = target.astype(jnp.float32)
    l1 = jnp.mean(jnp.abs(pred - target))

    def grads(x):
        return (x[:, :, :-1, :] - x[:, :, 1:, :],
                x[:, :, :, :-1] - x[:, :, :, 1:])

    pgx, pgy = grads(pred)
    tgx, tgy = grads(target)
    grad = jnp.mean(jnp.abs(pgx - tgx)) + jnp.mean(jnp.abs(pgy - tgy))

    pm = jnp.mean(pred, axis=(2, 3))
    tm = jnp.mean(target, axis=(2, 3))
    energy = jnp.mean((pm - tm) ** 2)
    ps = jnp.std(pred, axis=(2, 3), ddof=1)
    ts = jnp.std(target, axis=(2, 3), ddof=1)
    dist = jnp.mean((ps - ts) ** 2)
    rng = jnp.mean(jnp.maximum(jnp.abs(pred) - 1.0, 0.0))
    phys = energy + 0.5 * dist + 0.1 * rng
    return alpha * l1 + beta * grad + gamma * phys


# ----------------------------------------------------------------------------

if __name__ == "__main__":
    kp, kt = jax.random.split(jax.random.PRNGKey(0))
    fwd = jax.jit(amsr2_specific_loss)

    def check(pred, target, tol=5e-4):
        total, parts = fwd(pred, target)
        total = jax.block_until_ready(total)
        ref = float(_reference_loss(pred, target))
        got = float(total)
        assert bool(jnp.isfinite(total)), got
        assert abs(got - ref) <= tol * max(1.0, abs(ref)), (got, ref)
        # mimic PyTorch's `.item()` dict of Python floats (host-side, outside jit)
        return {k: float(v) for k, v in parts.items()}

    B, C, H, W = 2, 4, 16, 16
    pred = jax.random.normal(kp, (B, C, H, W), jnp.float32)
    target = jax.random.normal(kt, (B, C, H, W), jnp.float32)

    # 1) zero-mean data (original check)
    check(pred, target)

    # 2) brightness-temperature-like data (~250 K means, few-K stds):
    #    exercises the centred (two-pass) std path.
    check(3.0 * pred + 250.0, 3.0 * target + 251.0)

    # 3) B*C that does not divide the chosen block (ragged final block).
    pred3 = jax.random.normal(kp, (4, 5, H, W), jnp.float32)
    target3 = jax.random.normal(kt, (4, 5, H, W), jnp.float32)
    check(pred3, target3)

    # 4) bf16 inputs fed straight to the kernel (no wrapper f32 upcast).
    check(pred.astype(jnp.bfloat16), target.astype(jnp.bfloat16), tol=2e-3)

    print("KERNEL_OK")
</pallas_src>

<mosaic_0001>
module attributes {stable_mosaic.version = 11 : i64} {
  func.func @kernel(%arg0: i32, %arg1: memref<8x256xf32, #tpu.memory_space<vmem>>, %arg2: memref<8x256xf32, #tpu.memory_space<vmem>>, %arg3: memref<8x8xf32, #tpu.memory_space<vmem>>) attributes {dimension_semantics = [#tpu.dimension_semantics<parallel>], iteration_bounds = array<i64: 1>, scalar_prefetch = 0 : i64, scratch_operands = 0 : i64, tpu.core_type = #tpu.core_type<tc>, window_params = [{transform_indices = @transform_0, window_bounds = array<i64: 8, 256>}, {transform_indices = @transform_1, window_bounds = array<i64: 8, 256>}, {transform_indices = @transform_2, window_bounds = array<i64: 8, 8>}]} {
    %c0 = arith.constant 0 : index
    %c0_0 = arith.constant 0 : index
    %0 = vector.load %arg1[%c0, %c0_0] : memref<8x256xf32, #tpu.memory_space<vmem>>, vector<8x256xf32>
    %c0_1 = arith.constant 0 : index
    %c0_2 = arith.constant 0 : index
    %1 = vector.load %arg2[%c0_1, %c0_2] : memref<8x256xf32, #tpu.memory_space<vmem>>, vector<8x256xf32>
    %2 = arith.subf %0, %1 : vector<8x256xf32>
    %3 = math.absf %2 : vector<8x256xf32>
    %cst = arith.constant dense<0.000000e+00> : vector<8xf32>
    %4 = vector.multi_reduction <add>, %3, %cst [1] : vector<8x256xf32> to vector<8xf32>
    %5 = vector.shape_cast %4 : vector<8xf32> to vector<8x1xf32>
    %c0_3 = arith.constant 0 : index
    %c0_4 = arith.constant 0 : index
    %6 = vector.load %arg3[%c0_3, %c0_4] : memref<8x8xf32, #tpu.memory_space<vmem>>, vector<8x1xf32>
    tpu.vector_store %arg3[%c0_3, %c0_4], %5 {strides = array<i32>} : memref<8x8xf32, #tpu.memory_space<vmem>>, vector<8x1xf32>,
    %7 = vector.extract_strided_slice %2 {offsets = [0, 0], sizes = [8, 240], strides = [1, 1]} : vector<8x256xf32> to vector<8x240xf32>
    %8 = vector.extract_strided_slice %2 {offsets = [0, 16], sizes = [8, 240], strides = [1, 1]} : vector<8x256xf32> to vector<8x240xf32>
    %9 = arith.subf %7, %8 : vector<8x240xf32>
    %10 = math.absf %9 : vector<8x240xf32>
    %cst_5 = arith.constant dense<0.000000e+00> : vector<8xf32>
    %11 = vector.multi_reduction <add>, %10, %cst_5 [1] : vector<8x240xf32> to vector<8xf32>
    %12 = vector.shape_cast %11 : vector<8xf32> to vector<8x1xf32>
    %c0_6 = arith.constant 0 : index
    %c1 = arith.constant 1 : index
    %13 = vector.load %arg3[%c0_6, %c1] : memref<8x8xf32, #tpu.memory_space<vmem>>, vector<8x1xf32>
    tpu.vector_store %arg3[%c0_6, %c1], %12 {strides = array<i32>} : memref<8x8xf32, #tpu.memory_space<vmem>>, vector<8x1xf32>,
    %14 = vector.extract_strided_slice %2 {offsets = [0, 0], sizes = [8, 255], strides = [1, 1]} : vector<8x256xf32> to vector<8x255xf32>
    %15 = vector.extract_strided_slice %2 {offsets = [0, 1], sizes = [8, 255], strides = [1, 1]} : vector<8x256xf32> to vector<8x255xf32>
    %16 = arith.subf %14, %15 : vector<8x255xf32>
    %17 = math.absf %16 : vector<8x255xf32>
    %18 = tpu.iota {dimensions = array<i32: 1>} : vector<8x255xi32>
    %c16_i32 = arith.constant 16 : i32
    %c0_i32 = arith.constant 0 : i32
    %19 = arith.cmpi eq, %c16_i32, %c0_i32 : i32
    %c1_i32 = arith.constant 1 : i32
    %20 = arith.select %19, %c1_i32, %c16_i32 : i32
    %21 = vector.broadcast %20 : i32 to vector<8x255xi32>
    %22 = arith.remsi %18, %21 : vector<8x255xi32>
    %c0_i32_7 = arith.constant 0 : i32
    %23 = vector.broadcast %c0_i32_7 : i32 to vector<8x255xi32>
    %24 = arith.cmpi ne, %22, %23 : vector<8x255xi32>
    %c0_i32_8 = arith.constant 0 : i32
    %25 = vector.broadcast %c0_i32_8 : i32 to vector<8x255xi32>
    %26 = arith.cmpi slt, %22, %25 : vector<8x255xi32>
    %c0_i32_9 = arith.constant 0 : i32
    %27 = arith.cmpi slt, %20, %c0_i32_9 : i32
    %28 = vector.broadcast %27 : i1 to vector<8x255xi1>
    %29 = vector.broadcast %28 : vector<8x255xi1> to vector<8x255xi1>
    %30 = arith.xori %26, %29 : vector<8x255xi1>
    %31 = arith.andi %30, %24 : vector<8x255xi1>
    %32 = vector.broadcast %20 : i32 to vector<8x255xi32>
    %33 = arith.addi %22, %32 : vector<8x255xi32>
    %34 = arith.select %31, %33, %22 : vector<8x255xi1>, vector<8x255xi32>
    %c15_i32 = arith.constant 15 : i32
    %35 = vector.broadcast %c15_i32 : i32 to vector<8x255xi32>
    %36 = arith.cmpi ne, %34, %35 : vector<8x255xi32>
    %cst_10 = arith.constant 0.000000e+00 : f32
    %37 = vector.broadcast %cst_10 : f32 to vector<8x255xf32>
    %38 = arith.select %36, %17, %37 : vector<8x255xi1>, vector<8x255xf32>
    %cst_11 = arith.constant dense<0.000000e+00> : vector<8xf32>
    %39 = vector.multi_reduction <add>, %38, %cst_11 [1] : vector<8x255xf32> to vector<8xf32>
    %40 = vector.shape_cast %39 : vector<8xf32> to vector<8x1xf32>
    %c0_12 = arith.constant 0 : index
    %c2 = arith.constant 2 : index
    %41 = vector.load %arg3[%c0_12, %c2] : memref<8x8xf32, #tpu.memory_space<vmem>>, vector<8x1xf32>
    tpu.vector_store %arg3[%c0_12, %c2], %40 {strides = array<i32>} : memref<8x8xf32, #tpu.memory_space<vmem>>, vector<8x1xf32>,
    %42 = math.absf %0 : vector<8x256xf32>
    %cst_13 = arith.constant 1.000000e+00 : f32
    %43 = vector.broadcast %cst_13 : f32 to vector<8x256xf32>
    %44 = arith.subf %42, %43 : vector<8x256xf32>
    %cst_14 = arith.constant 0.000000e+00 : f32
    %45 = vector.broadcast %cst_14 : f32 to vector<8x256xf32>
    %46 = arith.maximumf %44, %45 : vector<8x256xf32>
    %cst_15 = arith.constant dense<0.000000e+00> : vector<8xf32>
    %47 = vector.multi_reduction <add>, %46, %cst_15 [1] : vector<8x256xf32> to vector<8xf32>
    %48 = vector.shape_cast %47 : vector<8xf32> to vector<8x1xf32>
    %c0_16 = arith.constant 0 : index
    %c3 = arith.constant 3 : index
    %49 = vector.load %arg3[%c0_16, %c3] : memref<8x8xf32, #tpu.memory_space<vmem>>, vector<8x1xf32>
    tpu.vector_store %arg3[%c0_16, %c3], %48 {strides = array<i32>} : memref<8x8xf32, #tpu.memory_space<vmem>>, vector<8x1xf32>,
    %cst_17 = arith.constant dense<0.000000e+00> : vector<8xf32>
    %50 = vector.multi_reduction <add>, %0, %cst_17 [1] : vector<8x256xf32> to vector<8xf32>
    %51 = vector.shape_cast %50 : vector<8xf32> to vector<8x1xf32>
    %cst_18 = arith.constant dense<0.000000e+00> : vector<8xf32>
    %52 = vector.multi_reduction <add>, %1, %cst_18 [1] : vector<8x256xf32> to vector<8xf32>
    %53 = vector.shape_cast %52 : vector<8xf32> to vector<8x1xf32>
    %cst_19 = arith.constant 3.906250e-03 : f32
    %54 = vector.broadcast %cst_19 : f32 to vector<8x1xf32>
    %55 = arith.mulf %51, %54 : vector<8x1xf32>
    %56 = vector.broadcast %55 : vector<8x1xf32> to vector<8x256xf32>
    %57 = arith.subf %0, %56 : vector<8x256xf32>
    %cst_20 = arith.constant 3.906250e-03 : f32
    %58 = vector.broadcast %cst_20 : f32 to vector<8x1xf32>
    %59 = arith.mulf %53, %58 : vector<8x1xf32>
    %60 = vector.broadcast %59 : vector<8x1xf32> to vector<8x256xf32>
    %61 = arith.subf %1, %60 : vector<8x256xf32>
    %c0_21 = arith.constant 0 : index
    %c4 = arith.constant 4 : index
    %62 = vector.load %arg3[%c0_21, %c4] : memref<8x8xf32, #tpu.memory_space<vmem>>, vector<8x1xf32>
    tpu.vector_store %arg3[%c0_21, %c4], %51 {strides = array<i32>} : memref<8x8xf32, #tpu.memory_space<vmem>>, vector<8x1xf32>,
    %63 = arith.mulf %57, %57 : vector<8x256xf32>
    %cst_22 = arith.constant dense<0.000000e+00> : vector<8xf32>
    %64 = vector.multi_reduction <add>, %63, %cst_22 [1] : vector<8x256xf32> to vector<8xf32>
    %65 = vector.shape_cast %64 : vector<8xf32> to vector<8x1xf32>
    %c0_23 = arith.constant 0 : index
    %c5 = arith.constant 5 : index
    %66 = vector.load %arg3[%c0_23, %c5] : memref<8x8xf32, #tpu.memory_space<vmem>>, vector<8x1xf32>
    tpu.vector_store %arg3[%c0_23, %c5], %65 {strides = array<i32>} : memref<8x8xf32, #tpu.memory_space<vmem>>, vector<8x1xf32>,
    %c0_24 = arith.constant 0 : index
    %c6 = arith.constant 6 : index
    %67 = vector.load %arg3[%c0_24, %c6] : memref<8x8xf32, #tpu.memory_space<vmem>>, vector<8x1xf32>
    tpu.vector_store %arg3[%c0_24, %c6], %53 {strides = array<i32>} : memref<8x8xf32, #tpu.memory_space<vmem>>, vector<8x1xf32>,
    %68 = arith.mulf %61, %61 : vector<8x256xf32>
    %cst_25 = arith.constant dense<0.000000e+00> : vector<8xf32>
    %69 = vector.multi_reduction <add>, %68, %cst_25 [1] : vector<8x256xf32> to vector<8xf32>
    %70 = vector.shape_cast %69 : vector<8xf32> to vector<8x1xf32>
    %c0_26 = arith.constant 0 : index
    %c7 = arith.constant 7 : index
    %71 = vector.load %arg3[%c0_26, %c7] : memref<8x8xf32, #tpu.memory_space<vmem>>, vector<8x1xf32>
    tpu.vector_store %arg3[%c0_26, %c7], %70 {strides = array<i32>} : memref<8x8xf32, #tpu.memory_space<vmem>>, vector<8x1xf32>,
    return
  }
  func.func @transform_0(%arg0: i32) -> (i32, i32) {
    %c0_i32 = arith.constant 0 : i32
    %c0_i32_0 = arith.constant 0 : i32
    return %arg0, %c0_i32 : i32, i32
  }
  func.func @transform_1(%arg0: i32) -> (i32, i32) {
    %c0_i32 = arith.constant 0 : i32
    %c0_i32_0 = arith.constant 0 : i32
    return %arg0, %c0_i32 : i32, i32
  }
  func.func @transform_2(%arg0: i32) -> (i32, i32) {
    %c0_i32 = arith.constant 0 : i32
    %c0_i32_0 = arith.constant 0 : i32
    return %arg0, %c0_i32 : i32, i32
  }
}

</mosaic_0001>

<bundles_post_ra>
// kernel: amsr2_specific_loss.1
= control target key start
LH: loop header
LB: loop body
LE: loop exit
PB: predicated region body
PF: predicated region fallthrough
CT: control target
= control target key end

     0   :  { %s142_s17 = smov 112   ;;  %s143_s18 = smov 127   ;;  %vm30_vm0 = vcmask 916480   ;;  %v56_v27 = vlaneseq  ;;  %vm48_vm1 = vcmask 1039360   ;;  %vm22_vm4 = vcmask 7168   ;;  %s195_s0 = inlined_call_operand.vmem [shape: f32[8,256], index: 0, kind: input, shape index: {}]   ;;  %s196_s1 = inlined_call_operand.vmem [shape: f32[8,256], index: 1, kind: input, shape index: {}]   ;;  %s197_s2 = inlined_call_operand.vmem [shape: f32[8,8], index: 2, kind: output, shape index: {}]  }
   0x1   :  { %v11_v0 = vld [vmem:[%s195_s0] sm:$0xff]  ;;  %v12_v1 = vld [vmem:[%s195_s0 + $0x8] sm:$0xff]  ;;  %vm42_vm5 = vcmask 15368   ;;  %vm91_vm6 = vcmask 23568   ;;  %vm102_vm7 = vcmask 31768   ;;  %vm116_vm8 = vcmask 39968  }
   0x2   :  { %v13_v2 = vld [vmem:[%s196_s1] sm:$0xff]  ;;  %v104_v3 = vadd.f32 %v12_v1, %v11_v0  ;;  %v14_v4 = vld [vmem:[%s196_s1 + $0x8] sm:$0xff]  ;;  %v93_v8 = vand.u32 2147483647, %v11_v0  ;;  %v94_v9 = vand.u32 2147483647, %v12_v1 }
   0x3   :  { %v15_v5 = vsub.f32 %v11_v0, %v13_v2  ;;  %v16_v6 = vsub.f32 %v12_v1, %v14_v4  ;;  %v107_v7 = vadd.f32 %v14_v4, %v13_v2  ;;  %v57_v28 = vand.u32 127, %v56_v27 }
   0x4   :  { %105 = vadd.xlane.f32.xlu0 %v104_v3  ;;  %v138_v12 = vadd.f32 -1.0, %v93_v8  ;;  %v139_v13 = vadd.f32 -1.0, %v94_v9  ;;  %vm123_vm9 = vcmask 48168   ;;  %vm125_vm10 = vcmask 56368  }
   0x5   :  { %26 = vrot.lane.b32.xlu1 %v15_v5, %s142_s17  ;;  %v17_v10 = vand.u32 2147483647, %v15_v5  ;;  %v18_v11 = vand.u32 2147483647, %v16_v6  ;;  %v58_v30 = vadd.s32 128, %v57_v28  ;;  %v63_v37 = vand.u32 15, %v57_v28 }
   0x6   :  { %v97_v15 = vmax.f32 %v138_v12, 0.0  ;;  %v98_v16 = vmax.f32 %v139_v13, 0.0  ;;  %vm132_vm11 = vcmask 64568  }
   0x7   :  { %v19_v14 = vadd.f32 %v18_v11, %v17_v10  ;;  %v70_v33 = vand.u32 15, %v58_v30  ;;  %vm83_vm3 = vcmp.ne.s32.totalorder %v63_v37, 15 }
   0x8   :  { %108 = vadd.xlane.f32.xlu0 %v107_v7  ;;  %v99_v17 = vadd.f32 %v98_v16, %v97_v15 }
   0x9   :  { %28 = vrot.lane.b32.xlu1 %v16_v6, %s142_s17  ;;  %vm84_vm2 = vcmp.ne.s32.totalorder %v70_v33, 15 }
   0xd   :  { %46 = vrot.lane.b32.xlu1 %v16_v6, %s143_s18 }
  0x1e   :  { %44 = vrot.lane.b32.xlu0 %v15_v5, %s143_s18 }
  0x31   :  { %20 = vadd.xlane.f32.xlu1 %v19_v14 }
  0x35   :  { %100 = vadd.xlane.f32.xlu1 %v99_v17 }
  0x77   :  { %v27_v18 = vpop.permute.xlu1 %26 }
  0x7b   :  { %v29_v19 = vpop.permute.xlu1 %28 }
  0x7c   :  { %v31_v20 = vsel %vm30_vm0, %v27_v18, %v29_v19  ;;  %v35_v21 = vsub.f32 %v16_v6, %v29_v19 }
  0x7d   :  { %v34_v22 = vsub.f32 %v15_v5, %v31_v20 }
  0x7e   :  { %v37_v23 = vand.u32 2147483647, %v35_v21 }
  0x7f   :  { %v36_v24 = vand.u32 2147483647, %v34_v22  ;;  %v47_v29 = vpop.permute.xlu1 %46 }
  0x80   :  { %v38_v25 = vsel %vm30_vm0, %v37_v23, 0.0  ;;  %v53_v32 = vsub.f32 %v16_v6, %v47_v29 }
  0x81   :  { %v39_v26 = vadd.f32 %v38_v25, %v36_v24 }
  0x82   :  { %v55_v35 = vand.u32 2147483647, %v53_v32 }
  0x83   :  { %40 = vadd.xlane.f32.xlu0 %v39_v26 }
  0x84   :  { %v86_v40 = vsel %vm84_vm2, %v55_v35, 0.0 }
  0x85   :  { %v87_v46 = vsel %vm48_vm1, %v86_v40, 0.0 }
  0x8d   :  { %v106_v31 = vpop.xlane.xlu0 %105 }
  0x8e   :  { %v110_v36 = vmul.f32 0.00390625, %v106_v31 }
  0x90   :  { %v111_v41 = vsub.f32 %v11_v0, %v110_v36  ;;  %v112_v43 = vsub.f32 %v12_v1, %v110_v36 }
  0x91   :  { %v109_v34 = vpop.xlane.xlu0 %108 }
  0x92   :  { %v113_v44 = vmul.f32 0.00390625, %v109_v34  ;;  %v118_v48 = vmul.f32 %v111_v41, %v111_v41  ;;  %v119_v52 = vmul.f32 %v112_v43, %v112_v43 }
  0x94   :  { %v114_v49 = vsub.f32 %v13_v2, %v113_v44  ;;  %v115_v50 = vsub.f32 %v14_v4, %v113_v44  ;;  %v120_v53 = vadd.f32 %v119_v52, %v118_v48 }
  0x95   :  { %v45_v38 = vpop.permute.xlu0 %44 }
  0x96   :  { %v49_v39 = vsel %vm48_vm1, %v45_v38, %v47_v29  ;;  %v127_v54 = vmul.f32 %v114_v49, %v114_v49  ;;  %v128_v55 = vmul.f32 %v115_v50, %v115_v50 }
  0x97   :  { %v52_v42 = vsub.f32 %v15_v5, %v49_v39 }
  0x98   :  { %v129_v56 = vadd.f32 %v128_v55, %v127_v54 }
  0x99   :  { %v54_v45 = vand.u32 2147483647, %v52_v42 }
  0x9b   :  { %v85_v47 = vsel %vm83_vm3, %v54_v45, 0.0 }
  0x9c   :  { %v88_v51 = vadd.f32 %v87_v46, %v85_v47 }
  0x9e   :  { %89 = vadd.xlane.f32.xlu1 %v88_v51 }
  0xa2   :  { %121 = vadd.xlane.f32.xlu1 %v120_v53 }
  0xa6   :  { %130 = vadd.xlane.f32.xlu1 %v129_v56 }
  0xba   :  { %v21_v57 = vpop.xlane.xlu1 %20 }
  0xbb   :  { %23 = vst.msk [vmem:[%s197_s2] sm:$0xff] %vm22_vm4, %v21_v57 }
  0xbe   :  { %v101_v59 = vpop.xlane.xlu1 %100 }
 0x10c   :  { %v41_v58 = vpop.xlane.xlu0 %40 }
 0x10d   :  { %43 = vst.msk [vmem:[%s197_s2] sm:$0xff] %vm42_vm5, %v41_v58 }
 0x127   :  { %v90_v60 = vpop.xlane.xlu1 %89 }
 0x128   :  { %92 = vst.msk [vmem:[%s197_s2] sm:$0xff] %vm91_vm6, %v90_v60 }
 0x129   :  { %103 = vst.msk [vmem:[%s197_s2] sm:$0xff] %vm102_vm7, %v101_v59 }
 0x12a   :  { %117 = vst.msk [vmem:[%s197_s2] sm:$0xff] %vm116_vm8, %v106_v31 }
 0x12b   :  { %v122_v61 = vpop.xlane.xlu1 %121 }
 0x12c   :  { %124 = vst.msk [vmem:[%s197_s2] sm:$0xff] %vm123_vm9, %v122_v61 }
 0x12d   :  { %126 = vst.msk [vmem:[%s197_s2] sm:$0xff] %vm125_vm10, %v109_v34 }
 0x12f   :  { %v131_v62 = vpop.xlane.xlu1 %130 }
 0x130   :  { %133 = vst.msk [vmem:[%s197_s2] sm:$0xff] %vm132_vm11, %v131_v62 }

</bundles_post_ra>
